<compile_context>
chip_gen: v7x
topology: tpu7x:2x2x1
jax: 0.10.0
libtpu: 0.0.40
codegen_flags: <defaults>
</compile_context>

<pallas_src>
import jax
import jax.numpy as jnp
from jax.experimental import pallas as pl
from jax.experimental.pallas import tpu as pltpu


def dgcn_kernel(adj_ref, z_ref, b_f_ref, o_ref):
    # adj arrives in its storage dtype; cast in-register to the compute dtype
    # (z's dtype) right before the MXU dot -- avoids a separate HBM convert pass.
    a = adj_ref[...].astype(z_ref.dtype)
    out = jnp.dot(a, z_ref[...], preferred_element_type=jnp.float32)
    o_ref[...] = (out + b_f_ref[...]).astype(o_ref.dtype)   # bias add in f32


def _pick_tiling(N, f_pad, adj_itemsize, z_itemsize, out_itemsize, row_tile=None):
    """Pick the adj row-tile and a VMEM limit sized to the real working set."""
    try:
        vmem_cap = int(pltpu.get_tpu_info().vmem_capacity_bytes)
    except Exception:
        vmem_cap = 128 * 1024 * 1024
    if vmem_cap <= 64 * 1024 * 1024:          # v7x-class: 64 MiB/TC, leave headroom
        budget = 48 * 1024 * 1024
    else:                                      # v5e / v6e: 128 MiB physical
        budget = 100 * 1024 * 1024

    z_resident = 2 * N * f_pad * z_itemsize    # per-batch z slab (double-buffered)

    def needed(tn):
        return (z_resident
                + 2 * tn * N * adj_itemsize        # adj double buffer (streamed)
                + 2 * tn * f_pad * out_itemsize    # output double buffer
                + 2 * f_pad * 4)                   # folded bias (negligible)

    if row_tile is not None:
        tn = min(row_tile, N)
    elif needed(N) <= budget:
        tn = N                                    # whole batch row-slab fits
    else:
        tn = 8                                    # floor (sublane multiple)
        # Largest 128-aligned tile (multiple of 8 below 128) that fits.
        # For extremely large N a K-tile (contraction) axis would be better;
        # at these budgets this fallback stays correct and VMEM-bounded.
        for cand in (1024, 512, 256, 128, 64, 32, 16, 8):
            if cand < N and needed(cand) <= budget:
                tn = cand
                break

    vmem_limit = int(max(min(budget, needed(tn) + 8 * 1024 * 1024),
                         16 * 1024 * 1024))
    return tn, vmem_limit


def differential_gcn(adj, x, params, *, compute_dtype=jnp.bfloat16,
                     out_dtype=None, row_tile=None):
    """adj: (B, N, N), x: (B, N, F_in) -> (B, N, F_out)."""
    w_in, b_in, w, b, w_out, b_out = params
    B, N, F_in = x.shape
    F_out = w_out.shape[1]
    out_dtype = x.dtype if out_dtype is None else out_dtype

    # ---- fold the three weight matrices / biases (tiny f32 matmuls) ----
    w_c = (w_in @ w) @ w_out              # (F_in, F_out)
    b_z = (b_in @ w) @ w_out              # (1, F_out)
    b_f = b @ w_out + b_out               # (1, F_out)

    # ---- lane-dense feature dim: pad F_out to a multiple of 128 ----
    f_pad = ((F_out + 127) // 128) * 128
    pad = f_pad - F_out
    if pad:
        w_c = jnp.pad(w_c, ((0, 0), (0, pad)))
        b_z = jnp.pad(b_z, ((0, 0), (0, pad)))
        b_f = jnp.pad(b_f, ((0, 0), (0, pad)))

    # ---- z = x @ W_c + b_z hoisted to a small XLA matmul (fed as kernel input)
    z = jnp.einsum("bnf,fo->bno",
                   x.astype(compute_dtype), w_c.astype(compute_dtype),
                   preferred_element_type=jnp.float32) + b_z
    z = z.astype(compute_dtype)           # (B, N, f_pad)
    b_f = b_f.astype(jnp.float32)         # bias add stays f32 (v5e VPU: no bf16)

    # ---- tiling / VMEM budget (generation-aware) ----
    tn, vmem_limit = _pick_tiling(
        N, f_pad,
        jnp.dtype(adj.dtype).itemsize,
        jnp.dtype(compute_dtype).itemsize,
        jnp.dtype(out_dtype).itemsize,
        row_tile=row_tile,
    )
    grid = (B, pl.cdiv(N, tn))

    grid_spec = pltpu.PrefetchScalarGridSpec(
        num_scalar_prefetch=0,
        grid=grid,
        in_specs=[
            # adj: one row-tile per grid step, streamed in storage dtype.
            # Ragged last tile is safe: out-of-range rows only feed output rows
            # that Pallas clips on writeback.
            pl.BlockSpec((pl.Squeezed(), tn, N), lambda bi, ri: (bi, ri, 0)),
            # z: full projected node slab for this batch (resident across ri).
            pl.BlockSpec((pl.Squeezed(), N, f_pad), lambda bi, ri: (bi, 0, 0)),
            # folded output bias (resident).
            pl.BlockSpec((1, f_pad), lambda bi, ri: (0, 0)),
        ],
        out_specs=pl.BlockSpec((pl.Squeezed(), tn, f_pad),
                               lambda bi, ri: (bi, ri, 0)),
    )

    out_padded = pl.pallas_call(
        dgcn_kernel,
        out_shape=jax.ShapeDtypeStruct((B, N, f_pad), out_dtype),
        grid_spec=grid_spec,
        compiler_params=pltpu.CompilerParams(
            # No cross-step carry anymore -> both axes are parallel (megacore
            # sharding works even when B == 1).
            dimension_semantics=("parallel", "parallel"),
            vmem_limit_bytes=vmem_limit,
        ),
    )(adj, z, b_f)

    return out_padded[..., :F_out] if pad else out_padded


def init_params(key, in_features, embed_dim, out_features):
    """Deterministic synthetic init mirroring the module's parameter shapes.

    Linear weights are stored pre-transposed as (in, out), so x @ W here is
    equivalent to PyTorch's x @ W^T with W of shape (out, in).
    """
    k = jax.random.split(key, 6)
    bnd_in = 1.0 / jnp.sqrt(in_features)
    w_in = jax.random.uniform(k[0], (in_features, embed_dim), jnp.float32, -bnd_in, bnd_in)
    b_in = jax.random.uniform(k[1], (1, embed_dim), jnp.float32, -bnd_in, bnd_in)
    std = 1.0 / jnp.sqrt(embed_dim)
    w = jax.random.uniform(k[2], (embed_dim, embed_dim), jnp.float32, -std, std)
    b = jax.random.uniform(k[3], (1, embed_dim), jnp.float32, -std, std)
    bnd_out = 1.0 / jnp.sqrt(embed_dim)
    w_out = jax.random.uniform(k[4], (embed_dim, out_features), jnp.float32, -bnd_out, bnd_out)
    b_out = jax.random.uniform(k[5], (1, out_features), jnp.float32, -bnd_out, bnd_out)
    return (w_in, b_in, w, b, w_out, b_out)


def reference(adj, x, params):
    """Unfused f32 reference matching the PyTorch module exactly."""
    w_in, b_in, w, b, w_out, b_out = params
    h = x @ w_in + b_in
    y = h @ w
    out = jnp.einsum("bij,bjk->bik", adj, y) + b
    return out @ w_out + b_out


if __name__ == "__main__":
    B, N = 2, 16
    in_features, embed_dim, out_features = 8, 32, 16

    key = jax.random.PRNGKey(0)
    k_adj, k_x, k_p = jax.random.split(key, 3)

    x = jax.random.normal(k_x, (B, N, in_features), jnp.float32)
    adj = jax.random.uniform(k_adj, (B, N, N), jnp.float32)
    adj = adj / jnp.sum(adj, axis=-1, keepdims=True)   # row-normalized adjacency

    params = init_params(k_p, in_features, embed_dim, out_features)
    ref = reference(adj, x, params)

    # f32 compute path: folding only re-associates the math -> tight check.
    out_f32 = jax.block_until_ready(
        differential_gcn(adj, x, params, compute_dtype=jnp.float32))
    assert out_f32.shape == (B, N, out_features)
    assert out_f32.dtype == jnp.float32
    assert jnp.allclose(out_f32, ref, atol=1e-4, rtol=1e-4), "f32 mismatch vs reference"

    # bf16 matmul operands with f32 accumulation (adj cast in-kernel): fast path.
    out_bf16 = jax.block_until_ready(
        differential_gcn(adj, x, params, compute_dtype=jnp.bfloat16))
    assert out_bf16.shape == (B, N, out_features)
    assert jnp.allclose(out_bf16, ref, atol=3e-2, rtol=3e-2), "bf16 mismatch vs reference"

    print("KERNEL_OK")
</pallas_src>

<mosaic_0001>
module attributes {stable_mosaic.version = 11 : i64} {
  func.func @dgcn_kernel(%arg0: i32, %arg1: i32, %arg2: memref<1x16x16xf32, #tpu.memory_space<vmem>>, %arg3: memref<1x16x128xf32, #tpu.memory_space<vmem>>, %arg4: memref<1x128xf32, #tpu.memory_space<vmem>>, %arg5: memref<1x16x128xf32, #tpu.memory_space<vmem>>) attributes {dimension_semantics = [#tpu.dimension_semantics<parallel>, #tpu.dimension_semantics<parallel>], iteration_bounds = array<i64: 2, 1>, scalar_prefetch = 0 : i64, scratch_operands = 0 : i64, tpu.core_type = #tpu.core_type<tc>, window_params = [{transform_indices = @transform_0, window_bounds = array<i64: 1, 16, 16>}, {transform_indices = @transform_1, window_bounds = array<i64: 1, 16, 128>}, {pipeline_mode = #tpu.pipeline_mode<synchronous>, transform_indices = @transform_2, window_bounds = array<i64: 1, 128>}, {transform_indices = @transform_3, window_bounds = array<i64: 1, 16, 128>}]} {
    %c0 = arith.constant 0 : index
    %c0_0 = arith.constant 0 : index
    %c0_1 = arith.constant 0 : index
    %0 = vector.load %arg2[%c0, %c0_0, %c0_1] : memref<1x16x16xf32, #tpu.memory_space<vmem>>, vector<1x16x16xf32>
    %1 = vector.shape_cast %0 : vector<1x16x16xf32> to vector<16x16xf32>
    %c0_2 = arith.constant 0 : index
    %c0_3 = arith.constant 0 : index
    %c0_4 = arith.constant 0 : index
    %2 = vector.load %arg3[%c0_2, %c0_3, %c0_4] : memref<1x16x128xf32, #tpu.memory_space<vmem>>, vector<1x16x128xf32>
    %3 = vector.shape_cast %2 : vector<1x16x128xf32> to vector<16x128xf32>
    %cst = arith.constant dense<0.000000e+00> : vector<16x128xf32>
    %4 = tpu.matmul %1, %3, %cst {dimension_numbers = #tpu.dot_dimension_numbers<[1], [0], [0], [1], [0, 0, 1, 1], [], []>} : vector<16x16xf32>, vector<16x128xf32>, vector<16x128xf32> -> vector<16x128xf32>
    %c0_5 = arith.constant 0 : index
    %c0_6 = arith.constant 0 : index
    %5 = vector.load %arg4[%c0_5, %c0_6] : memref<1x128xf32, #tpu.memory_space<vmem>>, vector<1x128xf32>
    %6 = vector.broadcast %5 : vector<1x128xf32> to vector<16x128xf32>
    %7 = arith.addf %4, %6 : vector<16x128xf32>
    %c0_7 = arith.constant 0 : index
    %c0_8 = arith.constant 0 : index
    %c0_9 = arith.constant 0 : index
    %8 = vector.load %arg5[%c0_7, %c0_8, %c0_9] : memref<1x16x128xf32, #tpu.memory_space<vmem>>, vector<1x16x128xf32>
    %9 = vector.shape_cast %8 : vector<1x16x128xf32> to vector<16x128xf32>
    %10 = vector.shape_cast %7 : vector<16x128xf32> to vector<1x16x128xf32>
    tpu.vector_store %arg5[%c0_7, %c0_8, %c0_9], %10 {strides = array<i32>} : memref<1x16x128xf32, #tpu.memory_space<vmem>>, vector<1x16x128xf32>,
    return
  }
  func.func @transform_0(%arg0: i32, %arg1: i32) -> (i32, i32, i32) {
    %c0_i32 = arith.constant 0 : i32
    %c0_i32_0 = arith.constant 0 : i32
    return %arg0, %arg1, %c0_i32 : i32, i32, i32
  }
  func.func @transform_1(%arg0: i32, %arg1: i32) -> (i32, i32, i32) {
    %c0_i32 = arith.constant 0 : i32
    %c0_i32_0 = arith.constant 0 : i32
    %c0_i32_1 = arith.constant 0 : i32
    return %arg0, %c0_i32, %c0_i32_0 : i32, i32, i32
  }
  func.func @transform_2(%arg0: i32, %arg1: i32) -> (i32, i32) {
    %c0_i32 = arith.constant 0 : i32
    %c0_i32_0 = arith.constant 0 : i32
    %c0_i32_1 = arith.constant 0 : i32
    return %c0_i32, %c0_i32_0 : i32, i32
  }
  func.func @transform_3(%arg0: i32, %arg1: i32) -> (i32, i32, i32) {
    %c0_i32 = arith.constant 0 : i32
    %c0_i32_0 = arith.constant 0 : i32
    return %arg0, %arg1, %c0_i32 : i32, i32, i32
  }
}

</mosaic_0001>

<bundles_post_ra>
// kernel: tpu_custom_call.1
= control target key start
LH: loop header
LB: loop body
LE: loop exit
PB: predicated region body
PF: predicated region fallthrough
CT: control target
= control target key end

     0   :  { %8 = vsyncpa [#allocation3], 0  ;;  %s995_s0 = inlined_call_operand.hbm [shape: f32[2,16,16], index: 0, kind: input, shape index: {}]   ;;  %s996_s1 = inlined_call_operand.hbm [shape: f32[2,16,128], index: 1, kind: input, shape index: {}]   ;;  %s997_s2 = inlined_call_operand.vmem [shape: f32[1,128], index: 2, kind: input, shape index: {}]   ;;  %s998_s3 = inlined_call_operand.hbm [shape: f32[2,16,128], index: 3, kind: output, shape index: {}]  }
   0x1   :  { %10 = vsyncpa [#allocation3 + $0x1], 0 }
   0x2   :  { %11 = vsyncpa [#allocation6], 0 }
   0x3   :  { %13 = vsyncpa [#allocation6 + $0x1], 0 }
   0x4   :  { %14 = vsyncpa [#allocation4], 0 }
   0x5   :  { %16 = vsyncpa [#allocation4 + $0x1], 0  ;;  %s756_s12 = smov 0   ;;  %s758_s13 = smov 0  }
   0x6   :  { %s760_s14 = smov 0   ;;  %s762_s15 = smov 0  }
   0x7   :  { %s764_s16 = smov 0   ;;  %s766_s17 = smov 0  }
   0x8 LB: > { %s470_s18 = sadd.s32 4294967295, %s727_s17   ;;  %s471_s19 = sadd.s32 4294967294, %s727_s17   ;;  %s727_s17 = sphi %s766_s17, %s22_s17   ;;  %s723_s16 = sphi %s764_s16, %s1016_s16   ;;  %s719_s15 = sphi %s762_s15, %s1015_s15   ;;  %s715_s14 = sphi %s760_s14, %s1014_s14   ;;  %s711_s13 = sphi %s758_s13, %s1013_s13   ;;  %s707_s12 = sphi %s756_s12, %s1012_s12  }
   0x9   : > { %s34_s20 = sadd.s32 1, %s723_s16  ;;  %s43_s21 = sadd.s32 1, %s715_s14 }
   0xa   : > { %p36_p0 = scmp.ge.s32.totalorder %s34_s20, 2  ;;  %p50_p1 = scmp.ne.s32.totalorder %s715_s14, %s711_s13 }
   0xb   : > { %p51_p2 = scmp.eq.s32.totalorder %s727_s17, 0  ;;  %p56_p3 = scmp.ne.s32.totalorder %s711_s13, %s707_s12 }
   0xc   : > { %s1018_s20 = smov (%p36_p0, %s34_s20), 0  ;;  %p57_p5 = scmp.eq.s32.totalorder %s470_s18, 0 }
   0xd   : > { %p797_p4 = por %p51_p2, %p50_p1  ;;  %s38_s23 = ssub.s32 %s723_s16, %s1018_s20 }
   0xe   : > { %p129_p6 = scmp.eq.s32.totalorder %s470_s18, 1  ;;  %p41_p7 = scmp.eq.s32.totalorder %s38_s23, 0 }
   0xf   : > { %p803_p8 = por %p57_p5, %p56_p3  ;;  %p135_p10 = scmp.eq.s32.totalorder %s471_s19, 1 }
  0x10   : > { %p807_p9 = por %p129_p6, %p50_p1  ;;  %p527_p13 = scmp.lt.s32.totalorder %s727_s17, 2 }
  0x11   : > { %s1002_s24 = scalar_select %p803_p8, 1, 0 }
  0x12   : > { %s1003_s25 = scalar_select %p807_p9, 1, 0 }
  0x13   : > { %s812_s26 = scalar_select %p41_p7, %s715_s14, %s43_s21  }
  0x14   : > { %p814_p11 = por %p135_p10, %p56_p3  ;;  %s821_s28 = sand.u32 1, %s715_s14  }
  0x15   : > { %s474_s29 = sshll.u32 %s821_s28, 4  ;;  %s492_s30 = sshll.u32 %s723_s16, 8 }
  0x16   : > { %s1004_s27 = scalar_select %p814_p11, 1, 0 }
  0x17   : > { %s830_s6 = scalar_lea.hbm %s995_s0, %s492_s30  ;;  %s162_s7 = scalar_lea.vmem [#allocation2], %s474_s29 }
  0x18   : > { %s171_s8 = sshll.u32 %s162_s7, 4  ;;  %p838_p0 = pnand %p527_p13, %p797_p4  ;;  %s834_s8 = int_to_ptr.vmem [resolvable:$true] %s171_s8 }
  0x19   : > { %s159_s10 = scalar_lea.sflag [#allocation3], %s821_s28  ;;  %s581_s11 = scalar_lea.hbm %s830_s6, 256 }
  0x1a   : > { %p582_p2 = scmp.ne.s32.totalorder %s830_s6, %s581_s11  ;;  %p583_p3 = pneg %p838_p0 }
  0x1b   : > { %s586_s21 = scalar_lea.hbm %s995_s0, 512  ;;  %p587_p4 = scmp.lt.u32.totalorder %s830_s6, %s995_s0 }
  0x1c   : > { %p584_p5 = pnand %p583_p3, %p582_p2  ;;  %p588_p7 = scmp.lt.u32.totalorder %s586_s21, %s581_s11 }
  0x1d   : > { %p590_p13 = scmp.lt.u32.totalorder %s581_s11, %s830_s6 }
  0x1e   : > { %p585_p6 = pneg %p584_p5  ;;  %p589_p10 = por %p588_p7, %p587_p4 }
  0x20   : > { %p591_p12 = por %p590_p13, %p589_p10 }
  0x22   : > { %p592_p1 = pnand %p591_p12, %p585_p6 }
  0x24   : > { %595 = shalt.err (!%p592_p1)
}
  0x25   : > { %s596_s4 = scalar_lea.vmem %s834_s8, 256  ;;  %s729_s5 = smov [#allocation2]  }
  0x26   : > { %p597_p2 = scmp.ne.s32.totalorder %s834_s8, %s596_s4  ;;  %s601_s7 = sshll.u32 %s729_s5, 4  ;;  %s602_s7 = int_to_ptr.vmem [resolvable:$false] %s601_s7 }
  0x27   : > { %s603_s18 = scalar_lea.vmem %s602_s7, 512  ;;  %p604_p9 = scmp.lt.s32.totalorder %s834_s8, %s602_s7 }
  0x28   : > { %p599_p5 = pnand %p597_p2, %p583_p3  ;;  %p605_p4 = scmp.lt.s32.totalorder %s603_s18, %s596_s4 }
  0x2a   : > { %p600_p11 = pneg %p599_p5  ;;  %p606_p7 = por %p605_p4, %p604_p9 }
  0x2c   : > { %p607_p10 = pnand %p606_p7, %p600_p11 }
  0x2e   : > { %610 = shalt.err (!%p607_p10)
}
  0x2f   : > { %s730_s11 = smov 128   ;;  %s731_s19 = smov 8  }
  0x30   : > { %519 = dma.hbm_to_vmem [thread:$0]  (!%p838_p0), %s830_s6, 256, %s834_s8, %s159_s10, %s730_s11, %s730_s11, %s731_s19  }
  0x31   : > { %p200_p9 = scmp.lt.s32.totalorder %s727_s17, 3  ;;  %s880_s23 = scalar_lea.hbm %s996_s1, %s492_s30 }
  0x32   : > { %p1006_p11 = scmp.ge.s32.totalorder %s727_s17, 1  ;;  %s185_s5 = scalar_lea.vmem [#allocation5], %s474_s29 }
  0x33   : > { %s192_s7 = sshll.u32 %s185_s5, 4  ;;  %s182_s6 = scalar_lea.sflag [#allocation6], %s821_s28  ;;  %s890_s7 = int_to_ptr.vmem [resolvable:$true] %s192_s7 }
  0x34   : > { %p884_p12 = pnand %p1006_p11, %p200_p9  ;;  %s611_s8 = scalar_lea.hbm %s880_s23, 256 }
  0x35   : > { %p612_p1 = scmp.ne.s32.totalorder %s880_s23, %s611_s8  ;;  %s616_s18 = scalar_lea.hbm %s996_s1, 512 }
  0x36   : > { %p617_p2 = scmp.lt.u32.totalorder %s880_s23, %s996_s1  ;;  %p618_p5 = scmp.lt.u32.totalorder %s616_s18, %s611_s8 }
  0x37   : > { %p614_p6 = pnand %p612_p1, %p583_p3  ;;  %p620_p7 = scmp.lt.u32.totalorder %s611_s8, %s880_s23 }
  0x38   : > { %p619_p4 = por %p618_p5, %p617_p2 }
  0x39   : > { %p615_p13 = pneg %p614_p6 }
  0x3a   : > { %p621_p10 = por %p620_p7, %p619_p4 }
  0x3c   : > { %p622_p9 = pnand %p621_p10, %p615_p13 }
  0x3e   : > { %625 = shalt.err (!%p622_p9)
}
  0x3f   : > { %s626_s29 = scalar_lea.vmem %s890_s7, 256  ;;  %s732_s5 = smov [#allocation5]  }
  0x40   : > { %p627_p11 = scmp.ne.s32.totalorder %s890_s7, %s626_s29  ;;  %s631_s30 = sshll.u32 %s732_s5, 4  ;;  %s632_s30 = int_to_ptr.vmem [resolvable:$false] %s631_s30 }
  0x41   : > { %s633_s10 = scalar_lea.vmem %s632_s30, 512  ;;  %p634_p8 = scmp.lt.s32.totalorder %s890_s7, %s632_s30 }
  0x42   : > { %p629_p1 = pnand %p627_p11, %p583_p3  ;;  %p635_p2 = scmp.lt.s32.totalorder %s633_s10, %s626_s29 }
  0x44   : > { %p630_p6 = pneg %p629_p1  ;;  %p636_p5 = por %p635_p2, %p634_p8 }
  0x46   : > { %p637_p4 = pnand %p636_p5, %p630_p6 }
  0x48   : > { %640 = shalt.err (!%p637_p4)
}
  0x49   : > { %522 = dma.hbm_to_vmem [thread:$0]  (!%p838_p0), %s880_s23, 256, %s890_s7, %s182_s6, %s730_s11, %s730_s11, %s731_s19  }
  0x4a   : > { %204 = sbr.rel (%p884_p12) target bundleno = 321 (0x141), region = 32  ;;  %s924_s8 = sand.u32 (!%p884_p12), 1, %s711_s13  }
  0x4b   : > { %s481_s18 = sshll.u32 (!%p884_p12), %s924_s8, 4  ;;  %s207_s21 = scalar_lea.sflag (!%p884_p12), [#allocation3], %s924_s8 }
  0x4c   : > { %s210_s9 = scalar_lea.vmem (!%p884_p12), [#allocation2], %s481_s18  ;;  %p1008_p8 = scmp.ne.s32.totalorder (!%p884_p12), %s1002_s24, 0 }
  0x51   : > { %694 = dma.done.wait (%p1008_p8), %s207_s21, 256  }
  0x52   : > { %696 = vsyncadd (%p1008_p8), %s207_s21, 4294967040  ;;  %s216_s28 = scalar_lea.sflag [#allocation6], %s924_s8  ;;  %s219_s11 = scalar_lea.vmem [#allocation5], %s481_s18 }
  0x53   : > { %698 = dma.done.wait (%p1008_p8), %s216_s28, 256  }
  0x54   : > { %700 = vsyncadd (%p1008_p8), %s216_s28, 4294967040  ;;  %vm260_vm0 = vcmask 130048   ;;  %v251_v0 = vld [vmem:[%s219_s11] sm:$0xff]  ;;  %v252_v1 = vld [vmem:[%s219_s11 + $0x8] sm:$0xff]  ;;  %s246_s19 = scalar_lea.vmem [#allocation7], %s481_s18  ;;  %s494_s24 = sshll.u32 %s719_s15, 8 }
  0x55   : > { %v249_v2 = vld [vmem:[%s210_s9] sm:$0xff]  ;;  %v506_v3 = vpack.c.bf16 %v252_v1, %v251_v0  ;;  %v250_v4 = vld [vmem:[%s210_s9 + $0x8] sm:$0xff]  ;;  %s360_s23 = sshll.u32 %s246_s19, 4  ;;  %s946_s29 = scalar_lea.hbm %s998_s3, %s494_s24  ;;  %s941_s23 = int_to_ptr.vmem [resolvable:$true] %s360_s23 }
  0x56   : > { %503 = vmatprep.mubr.msk.f32.mxu0 %vm260_vm0, %v249_v2  ;;  %v484_v5 = vld [vmem:[%s997_s2] ss:$0 sm:$0xff]  ;;  %s345_s5 = scalar_lea.sflag [#allocation4], %s924_s8  ;;  %s641_s30 = scalar_lea.vmem %s941_s23, 256 }
  0x57   : > { %507 = vmatprep.subr.bf16.mxu0 %v506_v3  ;;  %p642_p0 = scmp.ne.s32.totalorder %s941_s23, %s641_s30  ;;  %p1009_p3 = scmp.ne.s32.totalorder %s1003_s25, 0 }
  0x58   : > { %509 = vmatpush3.bf16.msra.mxu0 %v506_v3  ;;  %s733_s15 = smov [#allocation7]  }
  0x59   : > { %p643_p12 = pnand %p642_p0, %p1009_p3  ;;  %s645_s10 = sshll.u32 %s733_s15, 4  ;;  %s646_s10 = int_to_ptr.vmem [resolvable:$false] %s645_s10 }
  0x5a   : > { %s647_s18 = scalar_lea.vmem %s646_s10, 512  ;;  %p648_p7 = scmp.lt.s32.totalorder %s941_s23, %s646_s10 }
  0x5b   : > { %504 = vmatmul.mubr.msk.f32.vlgmr.msra.gmra.mrb[0].mxu0 %vm260_vm0, %v250_v4  ;;  %p644_p13 = pneg %p643_p12  ;;  %p649_p10 = scmp.lt.s32.totalorder %s647_s18, %s641_s30 }
  0x5d   : > { %p650_p9 = por %p649_p10, %p648_p7 }
  0x5f   : > { %p651_p11 = pnand %p650_p9, %p644_p13 }
 0x12e   : > { %v505_v6 = vpop.f32.mrb[0].mxu0 }
 0x12f   : > { %v339_v7 = vadd.f32 %v505_v6, %v484_v5  ;;  %v333_v8 = vpop.f32.mrb[1].mxu0 }
 0x130   : > { %v334_v9 = vadd.f32 %v484_v5, %v333_v8 }
 0x131   : > { %343 = vst [vmem:[%s246_s19 + $0x8] sm:$0xff] %v339_v7 }
 0x132   : > { %342 = vst [vmem:[%s246_s19] sm:$0xff] %v334_v9 }
 0x133   : > { %654 = shalt.err (!%p651_p11)
}
 0x134   : > { %s655_s21 = scalar_lea.hbm %s946_s29, 256  ;;  %s659_s11 = scalar_lea.hbm %s998_s3, 512 }
 0x135   : > { %p656_p1 = scmp.ne.s32.totalorder %s946_s29, %s655_s21  ;;  %p660_p5 = scmp.lt.u32.totalorder %s946_s29, %s998_s3 }
 0x136   : > { %p661_p4 = scmp.lt.u32.totalorder %s659_s11, %s655_s21  ;;  %p663_p0 = scmp.lt.u32.totalorder %s655_s21, %s946_s29 }
 0x137   : > { %p657_p6 = pnand %p656_p1, %p1009_p3 }
 0x138   : > { %p662_p8 = por %p661_p4, %p660_p5 }
 0x139   : > { %p658_p2 = pneg %p657_p6 }
 0x13a   : > { %p664_p12 = por %p663_p0, %p662_p8 }
 0x13c   : > { %p665_p13 = pnand %p664_p12, %p658_p2 }
 0x13e   : > { %668 = shalt.err (!%p665_p13)
}
 0x13f   : > { %s734_s7 = smov 128   ;;  %s735_s24 = smov 8  }
 0x140   : > { %514 = dma.vmem_to_hbm [thread:$0]  (%p1009_p3), %s941_s23, 256, %s946_s29, %s345_s5, %s734_s7, %s734_s7, %s735_s24  }
 0x141 PF: > { %s375_s6 = sand.u32 1, %s707_s12   ;;  %p1010_p7 = scmp.ne.s32.totalorder %s1004_s27, 0 }
 0x142   : > { %p1011_p10 = scmp.ge.s32.totalorder %s727_s17, 2  ;;  %s376_s22 = scalar_lea.sflag [#allocation4], %s375_s6 }
 0x144   : > { %p524_p9 = pnand %p1011_p10, %p1010_p7 }
 0x146   : > { %702 = dma.done.wait (!%p524_p9), %s376_s22, 256  }
 0x147   : > { %704 = vsyncadd (!%p524_p9), %s376_s22, 4294967040  ;;  %s22_s17 = sadd.s32 1, %s727_s17   ;;  %s1012_s12 = smov %s711_s13 }
 0x148   : > { %p19_p11 = scmp.ge.s32.totalorder %s22_s17, 4   ;;  %s1013_s13 = smov %s715_s14 }
 0x149   : > { %s1014_s14 = smov %s812_s26  ;;  %s1015_s15 = smov %s723_s16 }
 0x14a   : > { %s1016_s16 = smov %s1018_s20  ;;  %21 = sbr.rel (!%p19_p11) target bundleno = 8 (0x8), region = 90 }
 0x151   :  { %381 = vsyncpa [#allocation3], 1 }
 0x152   :  { %383 = vsyncpa [#allocation3 + $0x1], 1 }
 0x153   :  { %384 = vsyncpa [#allocation6], 1 }
 0x154   :  { %386 = vsyncpa [#allocation6 + $0x1], 1 }
 0x155   :  { %387 = vsyncpa [#allocation4], 1 }
 0x156   :  { %389 = vsyncpa [#allocation4 + $0x1], 1 }

</bundles_post_ra>
